<compile_context>
chip_gen: v7x
topology: tpu7x:2x2x1
jax: 0.10.0
libtpu: 0.0.40
codegen_flags: <defaults>
</compile_context>

<pallas_src>
import functools

import jax
import jax.numpy as jnp
from jax import lax
from jax.experimental import pallas as pl
from jax.experimental.pallas import tpu as pltpu


def _cdiv(a, b):
    return -(-a // b)


def _round_up(a, b):
    return _cdiv(a, b) * b


def _window_bounds(k, stride, pad, in_dim, out_dim):
    """Static per-output-window slice bounds.  Clamping == -inf padding here
    because pad <= k-1 (every window keeps >= 1 valid element) and stride == k
    (windows never overlap)."""
    bounds = []
    for o in range(out_dim):
        lo = o * stride - pad
        bounds.append((max(0, lo), min(in_dim, lo + k)))
    return tuple(bounds)


def _pool_untiled(t, axis, bounds):
    """Max-pool along an untiled (major) axis: elementwise maxima of
    unit-thickness slices -- lane-dense pure-VPU work, no relayout."""
    parts = []
    for lo, hi in bounds:
        idx = [slice(None)] * t.ndim
        idx[axis] = slice(lo, lo + 1)
        acc = t[tuple(idx)]
        for j in range(lo + 1, hi):
            idx[axis] = slice(j, j + 1)
            acc = jnp.maximum(acc, t[tuple(idx)])
        parts.append(acc)
    return parts[0] if len(parts) == 1 else jnp.concatenate(parts, axis=axis)


def _pool_sublane(t, axis, bounds):
    """Max-pool along the sublane (second-minor) axis: one contiguous slice +
    small cross-sublane max per window."""
    parts = []
    for lo, hi in bounds:
        idx = [slice(None)] * t.ndim
        idx[axis] = slice(lo, hi)
        parts.append(jnp.max(t[tuple(idx)], axis=axis, keepdims=True))
    return parts[0] if len(parts) == 1 else jnp.concatenate(parts, axis=axis)


def _maxpool3d_kernel(x_ref, o_ref, *, k, stride, pad, in_dims, out_dims):
    D, H, W = in_dims
    Do, Ho, Wo = out_dims
    x = x_ref[...]                                                  # (D, H, W, Bblk)
    # Depth then height (untiled axes): full-volume and volume/k passes on the
    # VPU at 100% lane occupancy (B sits on the lane axis).
    t = _pool_untiled(x, 0, _window_bounds(k, stride, pad, D, Do))  # (Do, H, W, B)
    t = _pool_untiled(t, 1, _window_bounds(k, stride, pad, H, Ho))  # (Do, Ho, W, B)
    # Width (sublane axis) last, on the k^2-reduced volume.
    t = _pool_sublane(t, 2, _window_bounds(k, stride, pad, W, Wo))  # (Do, Ho, Wo, B)
    o_ref[...] = t.astype(o_ref.dtype)
    # TODO(synk): for very large spatial dims, switch the per-window unroll to
    # interior-run reshape pooling ((n, k) split on the untiled axes) to cut
    # trace-time op count; total VPU work and numerics are identical.


def maxpool3d(x, k_size):
    """Forward of nn.MaxPool3d(k_size, padding=(k_size-1)//2)  (stride == k_size)."""
    k = int(k_size)
    stride = k                         # nn.MaxPool3d default: stride = kernel_size
    pad = (k - 1) // 2
    if stride != k or not (0 <= pad <= max(k - 1, 0)):
        # The clamped-window trick relies on disjoint windows and pad <= k-1.
        raise ValueError("maxpool3d requires stride == k_size and pad <= k_size-1")

    N, C, D, H, W = x.shape
    Do = (D + 2 * pad - k) // stride + 1
    Ho = (H + 2 * pad - k) // stride + 1
    Wo = (W + 2 * pad - k) // stride + 1
    B = N * C

    # Lane-dense layout: fused N*C axis minor (on the 128-lane axis).
    xt = jnp.transpose(x.reshape(B, D, H, W), (1, 2, 3, 0))        # (D, H, W, B)

    itemsize = x.dtype.itemsize
    sub = {4: 8, 2: 16, 1: 32}.get(itemsize, 8)    # sublane tile for this dtype

    # Padded VMEM bytes of one 128-lane-wide input block: the last two BlockSpec
    # dims are tiled to (sublane_tile, 128), so pad W and the lane dim.
    in_bytes_per_lane_block = D * H * _round_up(W, sub) * 128 * itemsize

    # Per-pipeline-buffer budget ~ VMEM/16 (v7x: 64 MiB -> 4 MiB, v5e/v6e:
    # 128 MiB -> 8 MiB), clamped to the measured mem-bound plateau (>= 2 MiB).
    try:
        vmem_cap = int(getattr(pltpu.get_tpu_info(), "vmem_capacity_bytes",
                               64 * 2**20))
    except Exception:
        vmem_cap = 64 * 2**20
    budget = max(2 * 2**20, min(8 * 2**20, vmem_cap // 16))

    if B <= 128:
        bblk = B                                    # equals the full array dim
    else:
        total_lb = _cdiv(B, 128)
        lb = min(max(1, budget // in_bytes_per_lane_block), total_lb)
        # Keep >= 2 grid steps along the "parallel" axis so both v7x TensorCores
        # get work and the BlockSpec pipeline actually double-buffers.
        lb = min(lb, _cdiv(total_lb, 2))
        bblk = max(1, lb) * 128
    grid_b = _cdiv(B, bblk)                         # ragged last block is fine

    lanes_pad = _round_up(bblk, 128)
    in_tile = D * H * _round_up(W, sub) * lanes_pad * itemsize
    out_tile = Do * Ho * _round_up(Wo, sub) * lanes_pad * itemsize
    # double-buffered in/out + in-kernel intermediates (~<= one more input tile
    # worth, counted twice for slack) + fixed headroom.
    vmem_need = 2 * in_tile + 2 * out_tile + 2 * in_tile + (2 << 20)
    vmem_limit = int(min(48 * 2**20, max(vmem_need, 32 * 2**20)))

    kernel = functools.partial(
        _maxpool3d_kernel, k=k, stride=stride, pad=pad,
        in_dims=(D, H, W), out_dims=(Do, Ho, Wo))

    cost = pl.CostEstimate(
        flops=B * Do * Ho * Wo * max(k ** 3 - 1, 1),
        transcendentals=0,
        bytes_accessed=(D * H * W + Do * Ho * Wo) * B * itemsize)

    out = pl.pallas_call(
        kernel,
        out_shape=jax.ShapeDtypeStruct((Do, Ho, Wo, B), x.dtype),
        grid_spec=pltpu.PrefetchScalarGridSpec(
            num_scalar_prefetch=0,
            grid=(grid_b,),
            in_specs=[pl.BlockSpec((D, H, W, bblk), lambda i: (0, 0, 0, i))],
            out_specs=pl.BlockSpec((Do, Ho, Wo, bblk), lambda i: (0, 0, 0, i)),
        ),
        compiler_params=pltpu.CompilerParams(
            dimension_semantics=("parallel",),
            vmem_limit_bytes=vmem_limit),
        cost_estimate=cost,
    )(xt)
    # TODO(synk): also tile the depth axis (halo-free since stride == k) for
    # volumes whose single (D, H, W, 128) slab exceeds the per-buffer budget.

    return jnp.transpose(out, (3, 0, 1, 2)).reshape(N, C, Do, Ho, Wo)


def maxpool3d_reference(x, k_size):
    """Pure-JAX reference matching nn.MaxPool3d(k, padding=(k-1)//2) forward."""
    pad = (k_size - 1) // 2
    return lax.reduce_window(
        x, -jnp.inf, lax.max,
        window_dimensions=(1, 1, k_size, k_size, k_size),
        window_strides=(1, 1, k_size, k_size, k_size),
        padding=((0, 0), (0, 0), (pad, pad), (pad, pad), (pad, pad)))


if __name__ == "__main__":
    key = jax.random.PRNGKey(0)
    configs = [
        # (N, C, D,  H,  W, k)
        (2, 128, 6, 12, 12, 3),   # B=256: lane-dense blocks, 2 "parallel" grid steps
        (2, 3,   4,  7,  9, 3),   # clamped first/last windows, ragged dims, B < 128
        (1, 5,   5,  9,  7, 2),   # even kernel -> pad=0, stride=2
    ]
    for (N, C, D, H, W, k) in configs:
        key, sub = jax.random.split(key)
        x = jax.random.normal(sub, (N, C, D, H, W), dtype=jnp.float32)
        out = jax.block_until_ready(maxpool3d(x, k))
        ref = maxpool3d_reference(x, k)
        assert out.shape == ref.shape, (out.shape, ref.shape)
        assert jnp.allclose(out, ref), f"mismatch vs reference for {(N, C, D, H, W, k)}"
    print("KERNEL_OK")
</pallas_src>

<mosaic_0001>
module attributes {stable_mosaic.version = 11 : i64} {
  func.func @_maxpool3d_kernel(%arg0: i32, %arg1: memref<6x12x12x128xf32, #tpu.memory_space<vmem>>, %arg2: memref<2x4x4x128xf32, #tpu.memory_space<vmem>>) attributes {dimension_semantics = [#tpu.dimension_semantics<parallel>], iteration_bounds = array<i64: 2>, scalar_prefetch = 0 : i64, scratch_operands = 0 : i64, tpu.core_type = #tpu.core_type<tc>, window_params = [{transform_indices = @transform_0, window_bounds = array<i64: 6, 12, 12, 128>}, {transform_indices = @transform_1, window_bounds = array<i64: 2, 4, 4, 128>}]} {
    %c0 = arith.constant 0 : index
    %c0_0 = arith.constant 0 : index
    %c0_1 = arith.constant 0 : index
    %c0_2 = arith.constant 0 : index
    %0 = vector.load %arg1[%c0, %c0_0, %c0_1, %c0_2] : memref<6x12x12x128xf32, #tpu.memory_space<vmem>>, vector<6x12x12x128xf32>
    %1 = vector.extract_strided_slice %0 {offsets = [0, 0, 0, 0], sizes = [1, 12, 12, 128], strides = [1, 1, 1, 1]} : vector<6x12x12x128xf32> to vector<1x12x12x128xf32>
    %2 = vector.extract_strided_slice %0 {offsets = [1, 0, 0, 0], sizes = [1, 12, 12, 128], strides = [1, 1, 1, 1]} : vector<6x12x12x128xf32> to vector<1x12x12x128xf32>
    %3 = arith.maximumf %1, %2 : vector<1x12x12x128xf32>
    %4 = vector.extract_strided_slice %0 {offsets = [2, 0, 0, 0], sizes = [1, 12, 12, 128], strides = [1, 1, 1, 1]} : vector<6x12x12x128xf32> to vector<1x12x12x128xf32>
    %5 = vector.extract_strided_slice %0 {offsets = [3, 0, 0, 0], sizes = [1, 12, 12, 128], strides = [1, 1, 1, 1]} : vector<6x12x12x128xf32> to vector<1x12x12x128xf32>
    %6 = arith.maximumf %4, %5 : vector<1x12x12x128xf32>
    %7 = vector.extract_strided_slice %0 {offsets = [4, 0, 0, 0], sizes = [1, 12, 12, 128], strides = [1, 1, 1, 1]} : vector<6x12x12x128xf32> to vector<1x12x12x128xf32>
    %8 = arith.maximumf %6, %7 : vector<1x12x12x128xf32>
    %9 = tpu.concatenate %3, %8 in 0 : vector<1x12x12x128xf32>, vector<1x12x12x128xf32> -> vector<2x12x12x128xf32>
    %10 = vector.extract_strided_slice %9 {offsets = [0, 0, 0, 0], sizes = [2, 1, 12, 128], strides = [1, 1, 1, 1]} : vector<2x12x12x128xf32> to vector<2x1x12x128xf32>
    %11 = vector.extract_strided_slice %9 {offsets = [0, 1, 0, 0], sizes = [2, 1, 12, 128], strides = [1, 1, 1, 1]} : vector<2x12x12x128xf32> to vector<2x1x12x128xf32>
    %12 = arith.maximumf %10, %11 : vector<2x1x12x128xf32>
    %13 = vector.extract_strided_slice %9 {offsets = [0, 2, 0, 0], sizes = [2, 1, 12, 128], strides = [1, 1, 1, 1]} : vector<2x12x12x128xf32> to vector<2x1x12x128xf32>
    %14 = vector.extract_strided_slice %9 {offsets = [0, 3, 0, 0], sizes = [2, 1, 12, 128], strides = [1, 1, 1, 1]} : vector<2x12x12x128xf32> to vector<2x1x12x128xf32>
    %15 = arith.maximumf %13, %14 : vector<2x1x12x128xf32>
    %16 = vector.extract_strided_slice %9 {offsets = [0, 4, 0, 0], sizes = [2, 1, 12, 128], strides = [1, 1, 1, 1]} : vector<2x12x12x128xf32> to vector<2x1x12x128xf32>
    %17 = arith.maximumf %15, %16 : vector<2x1x12x128xf32>
    %18 = vector.extract_strided_slice %9 {offsets = [0, 5, 0, 0], sizes = [2, 1, 12, 128], strides = [1, 1, 1, 1]} : vector<2x12x12x128xf32> to vector<2x1x12x128xf32>
    %19 = vector.extract_strided_slice %9 {offsets = [0, 6, 0, 0], sizes = [2, 1, 12, 128], strides = [1, 1, 1, 1]} : vector<2x12x12x128xf32> to vector<2x1x12x128xf32>
    %20 = arith.maximumf %18, %19 : vector<2x1x12x128xf32>
    %21 = vector.extract_strided_slice %9 {offsets = [0, 7, 0, 0], sizes = [2, 1, 12, 128], strides = [1, 1, 1, 1]} : vector<2x12x12x128xf32> to vector<2x1x12x128xf32>
    %22 = arith.maximumf %20, %21 : vector<2x1x12x128xf32>
    %23 = vector.extract_strided_slice %9 {offsets = [0, 8, 0, 0], sizes = [2, 1, 12, 128], strides = [1, 1, 1, 1]} : vector<2x12x12x128xf32> to vector<2x1x12x128xf32>
    %24 = vector.extract_strided_slice %9 {offsets = [0, 9, 0, 0], sizes = [2, 1, 12, 128], strides = [1, 1, 1, 1]} : vector<2x12x12x128xf32> to vector<2x1x12x128xf32>
    %25 = arith.maximumf %23, %24 : vector<2x1x12x128xf32>
    %26 = vector.extract_strided_slice %9 {offsets = [0, 10, 0, 0], sizes = [2, 1, 12, 128], strides = [1, 1, 1, 1]} : vector<2x12x12x128xf32> to vector<2x1x12x128xf32>
    %27 = arith.maximumf %25, %26 : vector<2x1x12x128xf32>
    %28 = tpu.concatenate %12, %17, %22, %27 in 1 : vector<2x1x12x128xf32>, vector<2x1x12x128xf32>, vector<2x1x12x128xf32>, vector<2x1x12x128xf32> -> vector<2x4x12x128xf32>
    %29 = vector.extract_strided_slice %28 {offsets = [0, 0, 0, 0], sizes = [2, 4, 2, 128], strides = [1, 1, 1, 1]} : vector<2x4x12x128xf32> to vector<2x4x2x128xf32>
    %cst = arith.constant dense<0xFF800000> : vector<2x4x128xf32>
    %30 = vector.multi_reduction <maximumf>, %29, %cst [2] : vector<2x4x2x128xf32> to vector<2x4x128xf32>
    %31 = vector.shape_cast %30 : vector<2x4x128xf32> to vector<2x4x1x128xf32>
    %32 = vector.extract_strided_slice %28 {offsets = [0, 0, 2, 0], sizes = [2, 4, 3, 128], strides = [1, 1, 1, 1]} : vector<2x4x12x128xf32> to vector<2x4x3x128xf32>
    %cst_3 = arith.constant dense<0xFF800000> : vector<2x4x128xf32>
    %33 = vector.multi_reduction <maximumf>, %32, %cst_3 [2] : vector<2x4x3x128xf32> to vector<2x4x128xf32>
    %34 = vector.shape_cast %33 : vector<2x4x128xf32> to vector<2x4x1x128xf32>
    %35 = vector.extract_strided_slice %28 {offsets = [0, 0, 5, 0], sizes = [2, 4, 3, 128], strides = [1, 1, 1, 1]} : vector<2x4x12x128xf32> to vector<2x4x3x128xf32>
    %cst_4 = arith.constant dense<0xFF800000> : vector<2x4x128xf32>
    %36 = vector.multi_reduction <maximumf>, %35, %cst_4 [2] : vector<2x4x3x128xf32> to vector<2x4x128xf32>
    %37 = vector.shape_cast %36 : vector<2x4x128xf32> to vector<2x4x1x128xf32>
    %38 = vector.extract_strided_slice %28 {offsets = [0, 0, 8, 0], sizes = [2, 4, 3, 128], strides = [1, 1, 1, 1]} : vector<2x4x12x128xf32> to vector<2x4x3x128xf32>
    %cst_5 = arith.constant dense<0xFF800000> : vector<2x4x128xf32>
    %39 = vector.multi_reduction <maximumf>, %38, %cst_5 [2] : vector<2x4x3x128xf32> to vector<2x4x128xf32>
    %40 = vector.shape_cast %39 : vector<2x4x128xf32> to vector<2x4x1x128xf32>
    %41 = tpu.concatenate %31, %34, %37, %40 in 2 : vector<2x4x1x128xf32>, vector<2x4x1x128xf32>, vector<2x4x1x128xf32>, vector<2x4x1x128xf32> -> vector<2x4x4x128xf32>
    %c0_6 = arith.constant 0 : index
    %c0_7 = arith.constant 0 : index
    %c0_8 = arith.constant 0 : index
    %c0_9 = arith.constant 0 : index
    %42 = vector.load %arg2[%c0_6, %c0_7, %c0_8, %c0_9] : memref<2x4x4x128xf32, #tpu.memory_space<vmem>>, vector<2x4x4x128xf32>
    tpu.vector_store %arg2[%c0_6, %c0_7, %c0_8, %c0_9], %41 {strides = array<i32>} : memref<2x4x4x128xf32, #tpu.memory_space<vmem>>, vector<2x4x4x128xf32>,
    return
  }
  func.func @transform_0(%arg0: i32) -> (i32, i32, i32, i32) {
    %c0_i32 = arith.constant 0 : i32
    %c0_i32_0 = arith.constant 0 : i32
    %c0_i32_1 = arith.constant 0 : i32
    %c0_i32_2 = arith.constant 0 : i32
    return %c0_i32, %c0_i32_0, %c0_i32_1, %arg0 : i32, i32, i32, i32
  }
  func.func @transform_1(%arg0: i32) -> (i32, i32, i32, i32) {
    %c0_i32 = arith.constant 0 : i32
    %c0_i32_0 = arith.constant 0 : i32
    %c0_i32_1 = arith.constant 0 : i32
    %c0_i32_2 = arith.constant 0 : i32
    return %c0_i32, %c0_i32_0, %c0_i32_1, %arg0 : i32, i32, i32, i32
  }
}

</mosaic_0001>

<bundles_post_ra>
// kernel: tpu_custom_call.1
= control target key start
LH: loop header
LB: loop body
LE: loop exit
PB: predicated region body
PF: predicated region fallthrough
CT: control target
= control target key end

     0   :  { %6 = vsyncpa [#allocation3], 0  ;;  %s1229_s0 = inlined_call_operand.hbm [shape: f32[6,12,12,256], index: 0, kind: input, shape index: {}]   ;;  %s1230_s1 = inlined_call_operand.hbm [shape: f32[2,4,4,256], index: 1, kind: output, shape index: {}]  }
   0x1   :  { %8 = vsyncpa [#allocation3 + $0x1], 0 }
   0x2   :  { %9 = vsyncpa [#allocation4], 0 }
   0x3   :  { %11 = vsyncpa [#allocation4 + $0x1], 0  ;;  %s865_s6 = smov 0   ;;  %s867_s7 = smov 0  }
   0x4   :  { %s869_s8 = smov 0   ;;  %s871_s9 = smov 0  }
   0x5 LB: > { %s886_s10 = sadd.s32 4294967295, %s845_s9   ;;  %s685_s11 = sadd.s32 4294967294, %s845_s9   ;;  %s845_s9 = sphi %s871_s9, %s1243_s9   ;;  %s841_s8 = sphi %s869_s8, %s1242_s8   ;;  %s837_s7 = sphi %s867_s7, %s1241_s7   ;;  %s833_s6 = sphi %s865_s6, %s1240_s6  }
   0x6   : > { %s890_s12 = sadd.s32 1, %s845_s9   ;;  %s24_s13 = sadd.s32 1, %s841_s8 }
   0x7   : > { %s21_s14 = ssub.s32 %s845_s9, %s890_s12  ;;  %p31_p0 = scmp.ne.s32.totalorder %s841_s8, %s837_s7 }
   0x8   : > { %p22_p1 = scmp.eq.s32.totalorder %s21_s14, 0  ;;  %p32_p2 = scmp.eq.s32.totalorder %s845_s9, 0 }
   0x9   : > { %p37_p3 = scmp.ne.s32.totalorder %s837_s7, %s833_s6  ;;  %p38_p4 = scmp.eq.s32.totalorder %s886_s10, 0 }
   0xa   : > { %s902_s15 = scalar_select %p22_p1, %s841_s8, %s24_s13  }
   0xb   : > { %p33_p5 = por %p32_p2, %p31_p0  ;;  %p904_p6 = por %p38_p4, %p37_p3 }
   0xc   : > { %p61_p7 = scmp.eq.s32.totalorder %s886_s10, 1  ;;  %p67_p8 = scmp.eq.s32.totalorder %s685_s11, 1 }
   0xd   : > { %p709_p10 = scmp.lt.s32.totalorder %s845_s9, 2  ;;  %s87_s19 = sand.u32 1, %s841_s8  }
   0xe   : > { %p911_p11 = por %p61_p7, %p31_p0  ;;  %p915_p12 = por %p67_p8, %p37_p3 }
   0xf   : > { %s688_s20 = sshll.u32 %s845_s9, 7  ;;  %s695_s21 = smul.u32 1152, %s87_s19 }
  0x10   : > { %s1233_s17 = scalar_select %p911_p11, 1, 0 }
  0x11   : > { %s1234_s18 = scalar_select %p915_p12, 1, 0 }
  0x12   : > { %s924_s24 = scalar_lea.hbm %s1229_s0, %s688_s20  ;;  %p926_p13 = pnand %p709_p10, %p33_p5 }
  0x13   : > { %s91_s26 = scalar_lea.vmem [#allocation2], %s695_s21  ;;  %s933_s28 = scalar_lea.sflag [#allocation3], %s87_s19 }
  0x14   : > { %s97_s27 = sshll.u32 %s91_s26, 4  ;;  %s749_s29 = scalar_lea.hbm %s924_s24, 18432  ;;  %s930_s27 = int_to_ptr.vmem [resolvable:$true] %s97_s27 }
  0x15   : > { %p750_p1 = scmp.ne.s32.totalorder %s924_s24, %s749_s29  ;;  %p751_p2 = pneg %p926_p13 }
  0x16   : > { %s754_s3 = scalar_lea.hbm %s1229_s0, 36864  ;;  %p755_p5 = scmp.lt.u32.totalorder %s924_s24, %s1229_s0 }
  0x17   : > { %p752_p3 = pnand %p751_p2, %p750_p1  ;;  %p756_p7 = scmp.lt.u32.totalorder %s754_s3, %s749_s29 }
  0x18   : > { %p758_p10 = scmp.lt.u32.totalorder %s749_s29, %s924_s24 }
  0x19   : > { %p753_p4 = pneg %p752_p3  ;;  %p757_p8 = por %p756_p7, %p755_p5 }
  0x1b   : > { %p759_p9 = por %p758_p10, %p757_p8 }
  0x1d   : > { %p760_p0 = pnand %p759_p9, %p753_p4 }
  0x1f   : > { %763 = shalt.err (!%p760_p0)
}
  0x20   : > { %s764_s11 = scalar_lea.vmem %s930_s27, 18432  ;;  %s847_s13 = smov [#allocation2]  }
  0x21   : > { %p765_p1 = scmp.ne.s32.totalorder %s930_s27, %s764_s11  ;;  %s769_s14 = sshll.u32 %s847_s13, 4  ;;  %s770_s14 = int_to_ptr.vmem [resolvable:$false] %s769_s14 }
  0x22   : > { %s771_s19 = scalar_lea.vmem %s770_s14, 36864  ;;  %p772_p11 = scmp.lt.s32.totalorder %s930_s27, %s770_s14 }
  0x23   : > { %p767_p3 = pnand %p765_p1, %p751_p2  ;;  %p773_p5 = scmp.lt.s32.totalorder %s771_s19, %s764_s11 }
  0x25   : > { %p768_p12 = pneg %p767_p3  ;;  %p774_p7 = por %p773_p5, %p772_p11 }
  0x27   : > { %p775_p8 = pnand %p774_p7, %p768_p12 }
  0x29   : > { %778 = shalt.err (!%p775_p8)
}
  0x2a   : > { %s848_s20 = smov 256   ;;  %s849_s21 = smov 128  }
  0x2b   : > { %s850_s22 = smov 8   ;;  %p105_p9 = scmp.lt.s32.totalorder %s845_s9, 3 }
  0x2c   : > { %704 = dma.hbm_to_vmem [thread:$0]  (!%p926_p13), %s924_s24, 18432, %s930_s27, %s933_s28, %s848_s20, %s849_s21, %s850_s22  }
  0x2d   : > { %p1236_p0 = scmp.ge.s32.totalorder %s845_s9, 1 }
  0x2f   : > { %p106_p2 = pnand %p1236_p0, %p105_p9 }
  0x30   : > { %s965_s23 = sand.u32 (!%p106_p2), 1, %s837_s7  }
  0x31   : > { %109 = sbr.rel (%p106_p2) target bundleno = 171 (0xab), region = 24  ;;  %s112_s29 = scalar_lea.sflag (!%p106_p2), [#allocation3], %s965_s23 }
  0x32   : > { %s696_s26 = smul.u32 (!%p106_p2), 1152, %s965_s23 }
  0x34   : > { %s969_s30 = scalar_lea.vmem (!%p106_p2), [#allocation2], %s696_s26 }
  0x38   : > { %824 = dma.done.wait (%p904_p6), %s112_s29, 18432  }
  0x39   : > { %826 = vsyncadd (%p904_p6), %s112_s29, 4294948864  ;;  %v134_v0 = vld [vmem:[%s969_s30] sm:$0xff]  ;;  %v135_v1 = vld [vmem:[%s969_s30 + $0x8] sm:$0xf]  ;;  %vm338_vm0 = vcmask 1041408   ;;  %vm395_vm1 = vcmask 1044482  }
  0x3a   : > { %v136_v2 = vld [vmem:[%s969_s30 + $0x10] sm:$0xff]  ;;  %v137_v3 = vld [vmem:[%s969_s30 + $0x18] sm:$0xf]  ;;  %v156_v4 = vld [vmem:[%s969_s30 + $0xc0] sm:$0xff]  ;;  %vm452_vm2 = vcmask 1047557   ;;  %vm509_vm3 = vcmask 1042432  }
  0x3b   : > { %v157_v5 = vld [vmem:[%s969_s30 + $0xc8] sm:$0xf]  ;;  %v158_v6 = vld [vmem:[%s969_s30 + $0xd0] sm:$0xff]  ;;  %v159_v7 = vld [vmem:[%s969_s30 + $0xd8] sm:$0xf]  ;;  %v244_v8 = vmax.f32 %v134_v0, %v156_v4  ;;  %vm566_vm4 = vcmask 1040384  }
  0x3c   : > { %v245_v9 = vmax.f32 %v135_v1, %v157_v5  ;;  %v138_v10 = vld [vmem:[%s969_s30 + $0x20] sm:$0xff]  ;;  %v246_v11 = vmax.f32 %v136_v2, %v158_v6  ;;  %v247_v12 = vmax.f32 %v137_v3, %v159_v7  ;;  %v139_v13 = vld [vmem:[%s969_s30 + $0x28] sm:$0xf]  ;;  %v140_v14 = vld [vmem:[%s969_s30 + $0x30] sm:$0xff]  ;;  %s690_s16 = sshll.u32 %s965_s23, 5  ;;  %s692_s27 = sshll.u32 %s886_s10, 6 }
  0x3d   : > { %v141_v15 = vld [vmem:[%s969_s30 + $0x38] sm:$0xf]  ;;  %v142_v16 = vld [vmem:[%s969_s30 + $0x40] sm:$0xff]  ;;  %v161_v20 = vld [vmem:[%s969_s30 + $0xe8] sm:$0xf]  ;;  %s1037_s24 = scalar_lea.vmem [#allocation5], %s690_s16  ;;  %s1182_s3 = scalar_lea.hbm %s1230_s1, %s692_s27 }
  0x3e   : > { %v160_v17 = vld [vmem:[%s969_s30 + $0xe0] sm:$0xff]  ;;  %v310_v18 = vmax.f32 %v244_v8, %v246_v11  ;;  %v311_v19 = vmax.f32 %v245_v9, %v247_v12  ;;  %v162_v21 = vld [vmem:[%s969_s30 + $0xf0] sm:$0xff]  ;;  %v163_v22 = vld [vmem:[%s969_s30 + $0xf8] sm:$0xf]  ;;  %v249_v27 = vmax.f32 %v139_v13, %v161_v20  ;;  %s612_s25 = sshll.u32 %s1037_s24, 4  ;;  %s600_s10 = scalar_lea.sflag [#allocation4], %s965_s23  ;;  %s1176_s25 = int_to_ptr.vmem [resolvable:$true] %s612_s25 }
  0x3f   : > { %v248_v23 = vmax.f32 %v138_v10, %v160_v17  ;;  %v143_v24 = vld [vmem:[%s969_s30 + $0x48] sm:$0xf]  ;;  %v164_v25 = vld [vmem:[%s969_s30 + $0x100] sm:$0xff]  ;;  %v250_v28 = vmax.f32 %v140_v14, %v162_v21  ;;  %v251_v29 = vmax.f32 %v141_v15, %v163_v22  ;;  %v1000_v34 = vld [vmem:[%s969_s30 + $0x50] sm:$0xff]  ;;  %s779_s4 = scalar_lea.vmem %s1176_s25, 512  ;;  %p1237_p11 = scmp.ne.s32.totalorder %s1233_s17, 0 }
  0x40   : > { %v165_v26 = vld [vmem:[%s969_s30 + $0x108] sm:$0xf]  ;;  %v339_v30 = vsel %vm338_vm0, %v310_v18, -inf  ;;  %v396_v31 = vsel %vm395_vm1, %v310_v18, -inf  ;;  %v453_v32 = vsel %vm452_vm2, %v310_v18, -inf  ;;  %v510_v33 = vsel %vm509_vm3, %v311_v19, -inf  ;;  %p780_p6 = scmp.ne.s32.totalorder %s1176_s25, %s779_s4 }
  0x41   : > { %v340_v35 = vrot.slane %v339_v30, 4  ;;  %v397_v36 = vrot.slane %v396_v31, 4  ;;  %v454_v37 = vrot.slane %v453_v32, 4  ;;  %v511_v38 = vrot.slane %v510_v33, 4  ;;  %v1003_v39 = vld [vmem:[%s969_s30 + $0x58] sm:$0xf] }
  0x42   : > { %v252_v40 = vmax.f32 %v142_v16, %v164_v25  ;;  %v253_v41 = vmax.f32 %v143_v24, %v165_v26  ;;  %v314_v42 = vmax.f32 %v248_v23, %v250_v28  ;;  %v315_v43 = vmax.f32 %v249_v27, %v251_v29  ;;  %v1006_v44 = vld [vmem:[%s969_s30 + $0x110] sm:$0xff]  ;;  %v1009_v49 = vld [vmem:[%s969_s30 + $0x118] sm:$0xf]  ;;  %v146_v6 = vld [vmem:[%s969_s30 + $0x60] sm:$0xff]  ;;  %p781_p12 = pnand %p780_p6, %p1237_p11  ;;  %s851_s5 = smov [#allocation5]  }
  0x43   : > { %v341_v45 = vmax.f32 %v339_v30, %v340_v35  ;;  %v398_v46 = vmax.f32 %v396_v31, %v397_v36  ;;  %v455_v47 = vmax.f32 %v453_v32, %v454_v37  ;;  %v512_v48 = vmax.f32 %v510_v33, %v511_v38  ;;  %v148_v7 = vld [vmem:[%s969_s30 + $0x70] sm:$0xff]  ;;  %v147_v12 = vld [vmem:[%s969_s30 + $0x68] sm:$0xf]  ;;  %v168_v17 = vld [vmem:[%s969_s30 + $0x120] sm:$0xff]  ;;  %s783_s11 = sshll.u32 %s851_s5, 4  ;;  %s784_s11 = int_to_ptr.vmem [resolvable:$false] %s783_s11 }
  0x44   : > { %v318_v50 = vmax.f32 %v314_v42, %v252_v40  ;;  %v319_v51 = vmax.f32 %v315_v43, %v253_v41  ;;  %v254_v52 = vmax.f32 %v1000_v34, %v1006_v44  ;;  %v255_v53 = vmax.f32 %v1003_v39, %v1009_v49  ;;  %v169_v18 = vld [vmem:[%s969_s30 + $0x128] sm:$0xf]  ;;  %v170_v19 = vld [vmem:[%s969_s30 + $0x130] sm:$0xff]  ;;  %v149_v24 = vld [vmem:[%s969_s30 + $0x78] sm:$0xf]  ;;  %p782_p13 = pneg %p781_p12  ;;  %s785_s13 = scalar_lea.vmem %s784_s11, 1024 }
  0x45   : > { %v342_v54 = vrot.slane %v341_v45, 2  ;;  %v399_v55 = vrot.slane %v398_v46, 2  ;;  %v456_v56 = vrot.slane %v455_v47, 2  ;;  %v513_v57 = vrot.slane %v512_v48, 2  ;;  %v171_v29 = vld [vmem:[%s969_s30 + $0x138] sm:$0xf]  ;;  %p786_p4 = scmp.lt.s32.totalorder %s1176_s25, %s784_s11  ;;  %p787_p10 = scmp.lt.s32.totalorder %s785_s13, %s779_s4 }
  0x46   : > { %v346_v58 = vsel %vm338_vm0, %v318_v50, -inf  ;;  %v403_v59 = vsel %vm395_vm1, %v318_v50, -inf  ;;  %v460_v60 = vsel %vm452_vm2, %v318_v50, -inf  ;;  %v517_v61 = vsel %vm509_vm3, %v319_v51, -inf  ;;  %v150_v34 = vld [vmem:[%s969_s30 + $0x80] sm:$0xff] }
  0x47   : > { %v343_v62 = vmax.f32 %v341_v45, %v342_v54  ;;  %v400_v63 = vmax.f32 %v398_v46, %v399_v55  ;;  %v457_v0 = vmax.f32 %v455_v47, %v456_v56  ;;  %v514_v1 = vmax.f32 %v512_v48, %v513_v57  ;;  %v151_v40 = vld [vmem:[%s969_s30 + $0x88] sm:$0xf]  ;;  %v172_v41 = vld [vmem:[%s969_s30 + $0x140] sm:$0xff]  ;;  %p788_p1 = por %p787_p10, %p786_p4 }
  0x48   : > { %v347_v2 = vrot.slane %v346_v58, 4  ;;  %v404_v3 = vrot.slane %v403_v59, 4  ;;  %v461_v4 = vrot.slane %v460_v60, 4  ;;  %v518_v5 = vrot.slane %v517_v61, 4  ;;  %v173_v42 = vld [vmem:[%s969_s30 + $0x148] sm:$0xf] }
  0x49   : > { %v344_v8 = vrot.slane %v343_v62, 1  ;;  %v401_v9 = vrot.slane %v400_v63, 1  ;;  %v458_v10 = vrot.slane %v457_v0, 1  ;;  %v515_v11 = vrot.slane %v514_v1, 1  ;;  %p789_p3 = pnand %p788_p1, %p782_p13 }
  0x4a   : > { %v348_v13 = vmax.f32 %v346_v58, %v347_v2  ;;  %v405_v14 = vmax.f32 %v403_v59, %v404_v3  ;;  %v462_v15 = vmax.f32 %v460_v60, %v461_v4  ;;  %v519_v16 = vmax.f32 %v517_v61, %v518_v5  ;;  %v154_v2 = vld [vmem:[%s969_s30 + $0xa0] sm:$0xff]  ;;  %v155_v3 = vld [vmem:[%s969_s30 + $0xa8] sm:$0xf] }
  0x4b   : > { %v345_v20 = vmax.f32 %v343_v62, %v344_v8  ;;  %v402_v21 = vmax.f32 %v400_v63, %v401_v9  ;;  %v459_v22 = vmax.f32 %v457_v0, %v458_v10  ;;  %v516_v23 = vmax.f32 %v514_v1, %v515_v11  ;;  %v153_v62 = vld [vmem:[%s969_s30 + $0x98] sm:$0xf]  ;;  %v174_v63 = vld [vmem:[%s969_s30 + $0x150] sm:$0xff]  ;;  %v176_v8 = vld [vmem:[%s969_s30 + $0x160] sm:$0xff] }
  0x4c   : > { %v349_v25 = vrot.slane %v348_v13, 2  ;;  %v406_v26 = vrot.slane %v405_v14, 2  ;;  %v463_v27 = vrot.slane %v462_v15, 2  ;;  %v520_v28 = vrot.slane %v519_v16, 2  ;;  %v175_v0 = vld [vmem:[%s969_s30 + $0x158] sm:$0xf] }
  0x4d   : > { %v567_v30 = vsel %vm566_vm4, %v345_v20, %v402_v21  ;;  %v256_v31 = vmax.f32 %v146_v6, %v168_v17  ;;  %v257_v32 = vmax.f32 %v147_v12, %v169_v18  ;;  %v258_v33 = vmax.f32 %v148_v7, %v170_v19  ;;  %v177_v9 = vld [vmem:[%s969_s30 + $0x168] sm:$0xf]  ;;  %v200_v20 = vld [vmem:[%s969_s30 + $0x240] sm:$0xff] }
  0x4e   : > { %v575_v35 = vsel %vm338_vm0, %v567_v30, %v459_v22  ;;  %v350_v36 = vmax.f32 %v348_v13, %v349_v25  ;;  %v407_v37 = vmax.f32 %v405_v14, %v406_v26  ;;  %v464_v38 = vmax.f32 %v462_v15, %v463_v27  ;;  %v1058_v14 = vld [vmem:[%s969_s30 + $0x180] sm:$0xff]  ;;  %v179_v19 = vld [vmem:[%s969_s30 + $0x188] sm:$0xf] }
  0x4f   : > { %v583_v43 = vsel %vm509_vm3, %v575_v35, %v516_v23  ;;  %v521_v44 = vmax.f32 %v519_v16, %v520_v28  ;;  %v259_v45 = vmax.f32 %v149_v24, %v171_v29  ;;  %v322_v46 = vmax.f32 %v254_v52, %v256_v31  ;;  %v152_v52 = vld [vmem:[%s969_s30 + $0x90] sm:$0xff]  ;;  %v201_v21 = vld [vmem:[%s969_s30 + $0x248] sm:$0xf] }
  0x50   : > { %591 = vst [vmem:[%s1037_s24] sm:$0xf] %v583_v43  ;;  %v351_v47 = vrot.slane %v350_v36, 1  ;;  %v408_v48 = vrot.slane %v407_v37, 1  ;;  %v465_v50 = vrot.slane %v464_v38, 1  ;;  %v323_v51 = vmax.f32 %v255_v53, %v257_v32  ;;  %v180_v43 = vld [vmem:[%s969_s30 + $0x190] sm:$0xff] }
  0x51   : > { %v522_v54 = vrot.slane %v521_v44, 1  ;;  %v326_v55 = vmax.f32 %v322_v46, %v258_v33  ;;  %v260_v56 = vmax.f32 %v150_v34, %v172_v41  ;;  %v261_v57 = vmax.f32 %v151_v40, %v173_v42 }
  0x52   : > { %v352_v58 = vmax.f32 %v350_v36, %v351_v47  ;;  %v409_v59 = vmax.f32 %v407_v37, %v408_v48  ;;  %v466_v60 = vmax.f32 %v464_v38, %v465_v50  ;;  %v327_v61 = vmax.f32 %v323_v51, %v259_v45  ;;  %v181_v48 = vld [vmem:[%s969_s30 + $0x198] sm:$0xf] }
  0x53   : > { %v523_v1 = vmax.f32 %v521_v44, %v522_v54  ;;  %v353_v39 = vsel %vm338_vm0, %v326_v55, -inf  ;;  %v410_v49 = vsel %vm395_vm1, %v326_v55, -inf  ;;  %v467_v53 = vsel %vm452_vm2, %v326_v55, -inf }
  0x54   : > { %v568_v4 = vsel %vm566_vm4, %v352_v58, %v409_v59  ;;  %v354_v5 = vrot.slane %v353_v39, 4  ;;  %v411_v6 = vrot.slane %v410_v49, 4  ;;  %v468_v7 = vrot.slane %v467_v53, 4 }
  0x55   : > { %v576_v10 = vsel %vm338_vm0, %v568_v4, %v466_v60  ;;  %v524_v11 = vsel %vm509_vm3, %v327_v61, -inf  ;;  %v262_v12 = vmax.f32 %v152_v52, %v174_v63  ;;  %v263_v13 = vmax.f32 %v153_v62, %v175_v0  ;;  %v202_v52 = vld [vmem:[%s969_s30 + $0x250] sm:$0xff] }
  0x56   : > { %v584_v15 = vsel %vm509_vm3, %v576_v10, %v523_v1  ;;  %v355_v16 = vmax.f32 %v353_v39, %v354_v5  ;;  %v412_v17 = vmax.f32 %v410_v49, %v411_v6  ;;  %v469_v18 = vmax.f32 %v467_v53, %v468_v7  ;;  %v222_v1 = vld [vmem:[%s969_s30 + $0x300] sm:$0xff]  ;;  %v223_v39 = vld [vmem:[%s969_s30 + $0x308] sm:$0xf] }
  0x57   : > { %592 = vst [vmem:[%s1037_s24 + $0x4] sm:$0xf] %v584_v15  ;;  %v525_v22 = vrot.slane %v524_v11, 4  ;;  %v264_v23 = vmax.f32 %v154_v2, %v176_v8  ;;  %v265_v24 = vmax.f32 %v155_v3, %v177_v9  ;;  %v330_v25 = vmax.f32 %v260_v56, %v262_v12  ;;  %v203_v56 = vld [vmem:[%s969_s30 + $0x258] sm:$0xf]  ;;  %v224_v2 = vld [vmem:[%s969_s30 + $0x310] sm:$0xff] }
  0x58   : > { %v356_v26 = vrot.slane %v355_v16, 2  ;;  %v413_v27 = vrot.slane %v412_v17, 2  ;;  %v470_v28 = vrot.slane %v469_v18, 2  ;;  %v331_v29 = vmax.f32 %v261_v57, %v263_v13  ;;  %v225_v9 = vld [vmem:[%s969_s30 + $0x318] sm:$0xf]  ;;  %v1081_v10 = vld [vmem:[%s969_s30 + $0x1a0] sm:$0xff] }
  0x59   : > { %v526_v30 = vmax.f32 %v524_v11, %v525_v22  ;;  %v334_v31 = vmax.f32 %v330_v25, %v264_v23  ;;  %v266_v32 = vmax.f32 %v1058_v14, %v200_v20  ;;  %v267_v33 = vmax.f32 %v179_v19, %v201_v21  ;;  %v204_v11 = vld [vmem:[%s969_s30 + $0x260] sm:$0xff]  ;;  %v184_v22 = vld [vmem:[%s969_s30 + $0x1b0] sm:$0xff] }
  0x5a   : > { %v357_v34 = vmax.f32 %v355_v16, %v356_v26  ;;  %v414_v35 = vmax.f32 %v412_v17, %v413_v27  ;;  %v471_v36 = vmax.f32 %v469_v18, %v470_v28  ;;  %v335_v37 = vmax.f32 %v331_v29, %v265_v24  ;;  %v183_v16 = vld [vmem:[%s969_s30 + $0x1a8] sm:$0xf]  ;;  %v206_v23 = vld [vmem:[%s969_s30 + $0x270] sm:$0xff] }
  0x5b   : > { %v527_v38 = vrot.slane %v526_v30, 2  ;;  %v360_v40 = vsel %vm338_vm0, %v334_v31, -inf  ;;  %v417_v41 = vsel %vm395_vm1, %v334_v31, -inf  ;;  %v474_v42 = vsel %vm452_vm2, %v334_v31, -inf  ;;  %v205_v17 = vld [vmem:[%s969_s30 + $0x268] sm:$0xf] }
  0x5c   : > { %v358_v44 = vrot.slane %v357_v34, 1  ;;  %v415_v45 = vrot.slane %v414_v35, 1  ;;  %v472_v46 = vrot.slane %v471_v36, 1  ;;  %v361_v47 = vrot.slane %v360_v40, 4 }
  0x5d   : > { %v528_v50 = vmax.f32 %v526_v30, %v527_v38  ;;  %v418_v51 = vrot.slane %v417_v41, 4  ;;  %v475_v54 = vrot.slane %v474_v42, 4  ;;  %v531_v55 = vsel %vm509_vm3, %v335_v37, -inf }
  0x5e   : > { %v359_v57 = vmax.f32 %v357_v34, %v358_v44  ;;  %v416_v58 = vmax.f32 %v414_v35, %v415_v45  ;;  %v473_v59 = vmax.f32 %v471_v36, %v472_v46  ;;  %v362_v60 = vmax.f32 %v360_v40, %v361_v47  ;;  %v185_v35 = vld [vmem:[%s969_s30 + $0x1b8] sm:$0xf]  ;;  %v187_v44 = vld [vmem:[%s969_s30 + $0x1c8] sm:$0xf]  ;;  %v208_v45 = vld [vmem:[%s969_s30 + $0x280] sm:$0xff] }
  0x5f   : > { %v529_v61 = vrot.slane %v528_v50, 1  ;;  %v419_v62 = vmax.f32 %v417_v41, %v418_v51  ;;  %v476_v63 = vmax.f32 %v474_v42, %v475_v54  ;;  %v532_v0 = vrot.slane %v531_v55, 4  ;;  %v207_v36 = vld [vmem:[%s969_s30 + $0x278] sm:$0xf]  ;;  %v209_v51 = vld [vmem:[%s969_s30 + $0x288] sm:$0xf] }
  0x60   : > { %v569_v49 = vsel %vm566_vm4, %v359_v57, %v416_v58  ;;  %v363_v53 = vrot.slane %v362_v60, 2  ;;  %v268_v3 = vmax.f32 %v180_v43, %v202_v52  ;;  %v269_v4 = vmax.f32 %v181_v48, %v203_v56  ;;  %v186_v43 = vld [vmem:[%s969_s30 + $0x1c0] sm:$0xff] }
  0x61   : > { %v530_v5 = vmax.f32 %v528_v50, %v529_v61  ;;  %v577_v6 = vsel %vm338_vm0, %v569_v49, %v473_v59  ;;  %v420_v7 = vrot.slane %v419_v62, 2  ;;  %v477_v8 = vrot.slane %v476_v63, 2  ;;  %v226_v56 = vld [vmem:[%s969_s30 + $0x320] sm:$0xff] }
  0x62   : > { %v364_v12 = vmax.f32 %v362_v60, %v363_v53  ;;  %v533_v13 = vmax.f32 %v531_v55, %v532_v0  ;;  %v288_v14 = vmax.f32 %v266_v32, %v222_v1  ;;  %v289_v15 = vmax.f32 %v267_v33, %v223_v39  ;;  %v229_v39 = vld [vmem:[%s969_s30 + $0x338] sm:$0xf]  ;;  %v230_v49 = vld [vmem:[%s969_s30 + $0x340] sm:$0xff] }
  0x63   : > { %v585_v18 = vsel %vm509_vm3, %v577_v6, %v530_v5  ;;  %v421_v19 = vmax.f32 %v419_v62, %v420_v7  ;;  %v478_v20 = vmax.f32 %v476_v63, %v477_v8  ;;  %v290_v21 = vmax.f32 %v268_v3, %v224_v2  ;;  %v227_v62 = vld [vmem:[%s969_s30 + $0x328] sm:$0xf]  ;;  %v228_v63 = vld [vmem:[%s969_s30 + $0x330] sm:$0xff] }
  0x64   : > { %593 = vst [vmem:[%s1037_s24 + $0x8] sm:$0xf] %v585_v18  ;;  %v365_v24 = vrot.slane %v364_v12, 1  ;;  %v534_v25 = vrot.slane %v533_v13, 2  ;;  %v291_v26 = vmax.f32 %v269_v4, %v225_v9  ;;  %v270_v27 = vmax.f32 %v1081_v10, %v204_v11  ;;  %v231_v6 = vld [vmem:[%s969_s30 + $0x348] sm:$0xf] }
  0x65   : > { %v422_v28 = vrot.slane %v421_v19, 1  ;;  %v479_v29 = vrot.slane %v478_v20, 1  ;;  %v312_v30 = vmax.f32 %v288_v14, %v290_v21  ;;  %v271_v31 = vmax.f32 %v183_v16, %v205_v17  ;;  %v189_v18 = vld [vmem:[%s969_s30 + $0x1d8] sm:$0xf] }
  0x66   : > { %v366_v32 = vmax.f32 %v364_v12, %v365_v24  ;;  %v535_v33 = vmax.f32 %v533_v13, %v534_v25  ;;  %v313_v34 = vmax.f32 %v289_v15, %v291_v26  ;;  %v272_v37 = vmax.f32 %v184_v22, %v206_v23  ;;  %v1112_v12 = vld [vmem:[%s969_s30 + $0x1d0] sm:$0xff]  ;;  %v190_v24 = vld [vmem:[%s969_s30 + $0x1e0] sm:$0xff] }
  0x67   : > { %v423_v38 = vmax.f32 %v421_v19, %v422_v28  ;;  %v480_v40 = vmax.f32 %v478_v20, %v479_v29  ;;  %v367_v41 = vsel %vm338_vm0, %v312_v30, -inf  ;;  %v424_v42 = vsel %vm395_vm1, %v312_v30, -inf  ;;  %v210_v13 = vld [vmem:[%s969_s30 + $0x290] sm:$0xff]  ;;  %v211_v19 = vld [vmem:[%s969_s30 + $0x298] sm:$0xf]  ;;  %v212_v25 = vld [vmem:[%s969_s30 + $0x2a0] sm:$0xff] }
  0x68   : > { %v536_v46 = vrot.slane %v535_v33, 1  ;;  %v368_v47 = vrot.slane %v367_v41, 4  ;;  %v425_v48 = vrot.slane %v424_v42, 4  ;;  %v481_v50 = vsel %vm452_vm2, %v312_v30, -inf }
  0x69   : > { %v570_v54 = vsel %vm566_vm4, %v366_v32, %v423_v38  ;;  %v482_v55 = vrot.slane %v481_v50, 4  ;;  %v538_v52 = vsel %vm509_vm3, %v313_v34, -inf  ;;  %v273_v57 = vmax.f32 %v185_v35, %v207_v36  ;;  %v193_v38 = vld [vmem:[%s969_s30 + $0x1f8] sm:$0xf] }
  0x6a   : > { %v537_v58 = vmax.f32 %v535_v33, %v536_v46  ;;  %v578_v59 = vsel %vm338_vm0, %v570_v54, %v480_v40  ;;  %v369_v60 = vmax.f32 %v367_v41, %v368_v47  ;;  %v426_v61 = vmax.f32 %v424_v42, %v425_v48  ;;  %v213_v46 = vld [vmem:[%s969_s30 + $0x2a8] sm:$0xf]  ;;  %v214_v54 = vld [vmem:[%s969_s30 + $0x2b0] sm:$0xff] }
  0x6b   : > { %v483_v0 = vmax.f32 %v481_v50, %v482_v55  ;;  %v539_v1 = vrot.slane %v538_v52, 4  ;;  %v274_v53 = vmax.f32 %v186_v43, %v208_v45  ;;  %v275_v2 = vmax.f32 %v187_v44, %v209_v51  ;;  %v192_v45 = vld [vmem:[%s969_s30 + $0x1f0] sm:$0xff]  ;;  %v215_v55 = vld [vmem:[%s969_s30 + $0x2b8] sm:$0xf] }
  0x6c   : > { %v586_v3 = vsel %vm509_vm3, %v578_v59, %v537_v58  ;;  %v370_v4 = vrot.slane %v369_v60, 2  ;;  %v427_v5 = vrot.slane %v426_v61, 2  ;;  %v292_v7 = vmax.f32 %v270_v27, %v226_v56  ;;  %v232_v59 = vld [vmem:[%s969_s30 + $0x350] sm:$0xff] }
  0x6d   : > { %594 = vst [vmem:[%s1037_s24 + $0xc] sm:$0xf] %v586_v3  ;;  %v484_v8 = vrot.slane %v483_v0, 2  ;;  %v540_v9 = vmax.f32 %v538_v52, %v539_v1  ;;  %v293_v10 = vmax.f32 %v271_v31, %v227_v62  ;;  %v294_v11 = vmax.f32 %v272_v37, %v228_v63  ;;  %v191_v37 = vld [vmem:[%s969_s30 + $0x1e8] sm:$0xf] }
  0x6e   : > { %v371_v14 = vmax.f32 %v369_v60, %v370_v4  ;;  %v428_v15 = vmax.f32 %v426_v61, %v427_v5  ;;  %v295_v16 = vmax.f32 %v273_v57, %v229_v39  ;;  %v296_v17 = vmax.f32 %v274_v53, %v230_v49  ;;  %v233_v63 = vld [vmem:[%s969_s30 + $0x358] sm:$0xf]  ;;  %v235_v1 = vld [vmem:[%s969_s30 + $0x368] sm:$0xf] }
  0x6f   : > { %v485_v20 = vmax.f32 %v483_v0, %v484_v8  ;;  %v541_v21 = vrot.slane %v540_v9, 2  ;;  %v297_v22 = vmax.f32 %v275_v2, %v231_v6  ;;  %v316_v23 = vmax.f32 %v292_v7, %v294_v11  ;;  %v234_v0 = vld [vmem:[%s969_s30 + $0x360] sm:$0xff]  ;;  %v236_v2 = vld [vmem:[%s969_s30 + $0x370] sm:$0xff]  ;;  %v237_v8 = vld [vmem:[%s969_s30 + $0x378] sm:$0xf] }
  0x70   : > { %v372_v26 = vrot.slane %v371_v14, 1  ;;  %v429_v27 = vrot.slane %v428_v15, 1  ;;  %v317_v28 = vmax.f32 %v293_v10, %v295_v16  ;;  %v276_v29 = vmax.f32 %v1112_v12, %v210_v13 }
  0x71   : > { %v486_v30 = vrot.slane %v485_v20, 1  ;;  %v542_v31 = vmax.f32 %v540_v9, %v541_v21  ;;  %v320_v32 = vmax.f32 %v316_v23, %v296_v17  ;;  %v277_v33 = vmax.f32 %v189_v18, %v211_v19  ;;  %v217_v21 = vld [vmem:[%s969_s30 + $0x2c8] sm:$0xf] }
  0x72   : > { %v373_v34 = vmax.f32 %v371_v14, %v372_v26  ;;  %v430_v35 = vmax.f32 %v428_v15, %v429_v27  ;;  %v321_v36 = vmax.f32 %v317_v28, %v297_v22  ;;  %v278_v40 = vmax.f32 %v190_v24, %v212_v25  ;;  %v194_v14 = vld [vmem:[%s969_s30 + $0x200] sm:$0xff]  ;;  %v196_v26 = vld [vmem:[%s969_s30 + $0x210] sm:$0xff] }
  0x73   : > { %v487_v41 = vmax.f32 %v485_v20, %v486_v30  ;;  %v543_v42 = vrot.slane %v542_v31, 1  ;;  %v374_v43 = vsel %vm338_vm0, %v320_v32, -inf  ;;  %v431_v44 = vsel %vm395_vm1, %v320_v32, -inf  ;;  %v216_v15 = vld [vmem:[%s969_s30 + $0x2c0] sm:$0xff]  ;;  %v195_v20 = vld [vmem:[%s969_s30 + $0x208] sm:$0xf] }
  0x74   : > { %v571_v47 = vsel %vm566_vm4, %v373_v34, %v430_v35  ;;  %v375_v48 = vrot.slane %v374_v43, 4  ;;  %v432_v50 = vrot.slane %v431_v44, 4  ;;  %v488_v51 = vsel %vm452_vm2, %v320_v32, -inf  ;;  %v218_v27 = vld [vmem:[%s969_s30 + $0x2d0] sm:$0xff] }
  0x75   : > { %v544_v52 = vmax.f32 %v542_v31, %v543_v42  ;;  %v579_v56 = vsel %vm338_vm0, %v571_v47, %v487_v41  ;;  %v489_v57 = vrot.slane %v488_v51, 4  ;;  %v545_v58 = vsel %vm509_vm3, %v321_v36, -inf  ;;  %v219_v41 = vld [vmem:[%s969_s30 + $0x2d8] sm:$0xf]  ;;  %v198_v47 = vld [vmem:[%s969_s30 + $0x220] sm:$0xff] }
  0x76   : > { %v376_v60 = vmax.f32 %v374_v43, %v375_v48  ;;  %v433_v61 = vmax.f32 %v431_v44, %v432_v50  ;;  %v546_v62 = vrot.slane %v545_v58, 4  ;;  %v279_v39 = vmax.f32 %v191_v37, %v213_v46  ;;  %v199_v48 = vld [vmem:[%s969_s30 + $0x228] sm:$0xf] }
  0x77   : > { %v587_v49 = vsel %vm509_vm3, %v579_v56, %v544_v52  ;;  %v490_v53 = vmax.f32 %v488_v51, %v489_v57  ;;  %v280_v3 = vmax.f32 %v192_v45, %v214_v54  ;;  %v281_v4 = vmax.f32 %v193_v38, %v215_v55  ;;  %v220_v52 = vld [vmem:[%s969_s30 + $0x2e0] sm:$0xff]  ;;  %v221_v56 = vld [vmem:[%s969_s30 + $0x2e8] sm:$0xf] }
  0x78   : > { %595 = vst [vmem:[%s1037_s24 + $0x10] sm:$0xf] %v587_v49  ;;  %v377_v5 = vrot.slane %v376_v60, 2  ;;  %v434_v6 = vrot.slane %v433_v61, 2  ;;  %v547_v7 = vmax.f32 %v545_v58, %v546_v62  ;;  %v298_v9 = vmax.f32 %v276_v29, %v232_v59  ;;  %v238_v57 = vld [vmem:[%s969_s30 + $0x380] sm:$0xff]  ;;  %v240_v49 = vld [vmem:[%s969_s30 + $0x390] sm:$0xff] }
  0x79   : > { %v491_v10 = vrot.slane %v490_v53, 2  ;;  %v299_v11 = vmax.f32 %v277_v33, %v233_v63  ;;  %v300_v12 = vmax.f32 %v278_v40, %v234_v0  ;;  %v301_v13 = vmax.f32 %v279_v39, %v235_v1  ;;  %v197_v40 = vld [vmem:[%s969_s30 + $0x218] sm:$0xf] }
  0x7a   : > { %v378_v16 = vmax.f32 %v376_v60, %v377_v5  ;;  %v435_v17 = vmax.f32 %v433_v61, %v434_v6  ;;  %v548_v18 = vrot.slane %v547_v7, 2  ;;  %v302_v19 = vmax.f32 %v280_v3, %v236_v2  ;;  %v239_v61 = vld [vmem:[%s969_s30 + $0x388] sm:$0xf]  ;;  %v242_v2 = vld [vmem:[%s969_s30 + $0x3a0] sm:$0xff] }
  0x7b   : > { %v492_v22 = vmax.f32 %v490_v53, %v491_v10  ;;  %v303_v23 = vmax.f32 %v281_v4, %v237_v8  ;;  %v324_v24 = vmax.f32 %v298_v9, %v300_v12  ;;  %v325_v25 = vmax.f32 %v299_v11, %v301_v13  ;;  %v241_v53 = vld [vmem:[%s969_s30 + $0x398] sm:$0xf]  ;;  %v243_v4 = vld [vmem:[%s969_s30 + $0x3a8] sm:$0xf] }
  0x7c   : > { %v379_v28 = vrot.slane %v378_v16, 1  ;;  %v436_v29 = vrot.slane %v435_v17, 1  ;;  %v549_v30 = vmax.f32 %v547_v7, %v548_v18  ;;  %v282_v31 = vmax.f32 %v194_v14, %v216_v15 }
  0x7d   : > { %v493_v32 = vrot.slane %v492_v22, 1  ;;  %v328_v33 = vmax.f32 %v324_v24, %v302_v19  ;;  %v329_v34 = vmax.f32 %v325_v25, %v303_v23  ;;  %v283_v35 = vmax.f32 %v195_v20, %v217_v21 }
  0x7e   : > { %v380_v36 = vmax.f32 %v378_v16, %v379_v28  ;;  %v437_v37 = vmax.f32 %v435_v17, %v436_v29  ;;  %v550_v38 = vrot.slane %v549_v30, 1  ;;  %v284_v42 = vmax.f32 %v196_v26, %v218_v27 }
  0x7f   : > { %v494_v43 = vmax.f32 %v492_v22, %v493_v32  ;;  %v381_v44 = vsel %vm338_vm0, %v328_v33, -inf  ;;  %v438_v45 = vsel %vm395_vm1, %v328_v33, -inf  ;;  %v495_v46 = vsel %vm452_vm2, %v328_v33, -inf }
  0x80   : > { %v551_v50 = vmax.f32 %v549_v30, %v550_v38  ;;  %v572_v51 = vsel %vm566_vm4, %v380_v36, %v437_v37  ;;  %v382_v54 = vrot.slane %v381_v44, 4  ;;  %v439_v55 = vrot.slane %v438_v45, 4 }
  0x81   : > { %v580_v58 = vsel %vm338_vm0, %v572_v51, %v494_v43  ;;  %v496_v59 = vrot.slane %v495_v46, 4  ;;  %v552_v60 = vsel %vm509_vm3, %v329_v34, -inf  ;;  %v285_v62 = vmax.f32 %v197_v40, %v219_v41 }
  0x82   : > { %v588_v63 = vsel %vm509_vm3, %v580_v58, %v551_v50  ;;  %v383_v0 = vmax.f32 %v381_v44, %v382_v54  ;;  %v440_v1 = vmax.f32 %v438_v45, %v439_v55  ;;  %v553_v39 = vrot.slane %v552_v60, 4 }
  0x83   : > { %596 = vst [vmem:[%s1037_s24 + $0x14] sm:$0xf] %v588_v63  ;;  %v497_v3 = vmax.f32 %v495_v46, %v496_v59  ;;  %v286_v5 = vmax.f32 %v198_v47, %v220_v52  ;;  %v287_v6 = vmax.f32 %v199_v48, %v221_v56  ;;  %v304_v7 = vmax.f32 %v282_v31, %v238_v57 }
  0x84   : > { %v384_v8 = vrot.slane %v383_v0, 2  ;;  %v441_v9 = vrot.slane %v440_v1, 2  ;;  %v554_v10 = vmax.f32 %v552_v60, %v553_v39  ;;  %v305_v11 = vmax.f32 %v283_v35, %v239_v61 }
  0x85   : > { %v498_v12 = vrot.slane %v497_v3, 2  ;;  %v306_v13 = vmax.f32 %v284_v42, %v240_v49  ;;  %v307_v14 = vmax.f32 %v285_v62, %v241_v53  ;;  %v308_v15 = vmax.f32 %v286_v5, %v242_v2 }
  0x86   : > { %v385_v16 = vmax.f32 %v383_v0, %v384_v8  ;;  %v442_v17 = vmax.f32 %v440_v1, %v441_v9  ;;  %v555_v18 = vrot.slane %v554_v10, 2  ;;  %v309_v19 = vmax.f32 %v287_v6, %v243_v4 }
  0x87   : > { %v499_v20 = vmax.f32 %v497_v3, %v498_v12  ;;  %v332_v21 = vmax.f32 %v304_v7, %v306_v13  ;;  %v333_v22 = vmax.f32 %v305_v11, %v307_v14 }
  0x88   : > { %v386_v23 = vrot.slane %v385_v16, 1  ;;  %v443_v24 = vrot.slane %v442_v17, 1  ;;  %v556_v25 = vmax.f32 %v554_v10, %v555_v18 }
  0x89   : > { %v500_v26 = vrot.slane %v499_v20, 1  ;;  %v336_v27 = vmax.f32 %v332_v21, %v308_v15  ;;  %v337_v28 = vmax.f32 %v333_v22, %v309_v19 }
  0x8a   : > { %v387_v29 = vmax.f32 %v385_v16, %v386_v23  ;;  %v444_v30 = vmax.f32 %v442_v17, %v443_v24  ;;  %v557_v31 = vrot.slane %v556_v25, 1 }
  0x8b   : > { %v501_v32 = vmax.f32 %v499_v20, %v500_v26  ;;  %v388_v33 = vsel %vm338_vm0, %v336_v27, -inf  ;;  %v445_v34 = vsel %vm395_vm1, %v336_v27, -inf  ;;  %v502_v35 = vsel %vm452_vm2, %v336_v27, -inf }
  0x8c   : > { %v558_v36 = vmax.f32 %v556_v25, %v557_v31  ;;  %v573_v37 = vsel %vm566_vm4, %v387_v29, %v444_v30  ;;  %v389_v38 = vrot.slane %v388_v33, 4  ;;  %v446_v40 = vrot.slane %v445_v34, 4 }
  0x8d   : > { %v581_v41 = vsel %vm338_vm0, %v573_v37, %v501_v32  ;;  %v503_v42 = vrot.slane %v502_v35, 4  ;;  %v559_v43 = vsel %vm509_vm3, %v337_v28, -inf }
  0x8e   : > { %v589_v44 = vsel %vm509_vm3, %v581_v41, %v558_v36  ;;  %v390_v45 = vmax.f32 %v388_v33, %v389_v38  ;;  %v447_v46 = vmax.f32 %v445_v34, %v446_v40  ;;  %v560_v47 = vrot.slane %v559_v43, 4 }
  0x8f   : > { %597 = vst [vmem:[%s1037_s24 + $0x18] sm:$0xf] %v589_v44  ;;  %v504_v48 = vmax.f32 %v502_v35, %v503_v42 }
  0x90   : > { %v391_v50 = vrot.slane %v390_v45, 2  ;;  %v448_v51 = vrot.slane %v447_v46, 2  ;;  %v561_v54 = vmax.f32 %v559_v43, %v560_v47 }
  0x91   : > { %v505_v55 = vrot.slane %v504_v48, 2 }
  0x92   : > { %v392_v52 = vmax.f32 %v390_v45, %v391_v50  ;;  %v449_v56 = vmax.f32 %v447_v46, %v448_v51  ;;  %v562_v57 = vrot.slane %v561_v54, 2 }
  0x93   : > { %v506_v58 = vmax.f32 %v504_v48, %v505_v55 }
  0x94   : > { %v393_v59 = vrot.slane %v392_v52, 1  ;;  %v450_v60 = vrot.slane %v449_v56, 1  ;;  %v563_v61 = vmax.f32 %v561_v54, %v562_v57 }
  0x95   : > { %v507_v62 = vrot.slane %v506_v58, 1 }
  0x96   : > { %v394_v63 = vmax.f32 %v392_v52, %v393_v59  ;;  %v451_v0 = vmax.f32 %v449_v56, %v450_v60  ;;  %v564_v1 = vrot.slane %v563_v61, 1 }
  0x97   : > { %v508_v39 = vmax.f32 %v506_v58, %v507_v62 }
  0x98   : > { %v565_v49 = vmax.f32 %v563_v61, %v564_v1  ;;  %v574_v53 = vsel %vm566_vm4, %v394_v63, %v451_v0 }
  0x99   : > { %v582_v2 = vsel %vm338_vm0, %v574_v53, %v508_v39 }
  0x9a   : > { %v590_v3 = vsel %vm509_vm3, %v582_v2, %v565_v49 }
  0x9b   : > { %598 = vst [vmem:[%s1037_s24 + $0x1c] sm:$0xf] %v590_v3 }
  0x9c   : > { %792 = shalt.err (!%p789_p3)
}
  0x9d   : > { %s793_s14 = scalar_lea.hbm %s1182_s3, 512  ;;  %s797_s21 = scalar_lea.hbm %s1230_s1, 1024 }
  0x9e   : > { %p794_p5 = scmp.ne.s32.totalorder %s1182_s3, %s793_s14  ;;  %p798_p9 = scmp.lt.u32.totalorder %s1182_s3, %s1230_s1 }
  0x9f   : > { %p799_p0 = scmp.lt.u32.totalorder %s797_s21, %s793_s14  ;;  %p801_p6 = scmp.lt.u32.totalorder %s793_s14, %s1182_s3 }
  0xa0   : > { %p795_p7 = pnand %p794_p5, %p1237_p11 }
  0xa1   : > { %p800_p2 = por %p799_p0, %p798_p9 }
  0xa2   : > { %p796_p8 = pneg %p795_p7 }
  0xa3   : > { %p802_p12 = por %p801_p6, %p800_p2 }
  0xa5   : > { %p803_p13 = pnand %p802_p12, %p796_p8 }
  0xa7   : > { %806 = shalt.err (!%p803_p13)
}
  0xa8   : > { %s852_s29 = smov 64   ;;  %s853_s30 = smov 128  }
  0xa9   : > { %s854_s16 = smov 4  }
  0xaa   : > { %699 = dma.vmem_to_hbm [thread:$0]  (%p1237_p11), %s1176_s25, 512, %s1182_s3, %s600_s10, %s852_s29, %s853_s30, %s854_s16  }
  0xab PF: > { %s627_s24 = sand.u32 1, %s833_s6   ;;  %p1238_p4 = scmp.ne.s32.totalorder %s1234_s18, 0 }
  0xac   : > { %p1239_p10 = scmp.ge.s32.totalorder %s845_s9, 2  ;;  %s628_s27 = scalar_lea.sflag [#allocation4], %s627_s24 }
  0xae   : > { %p706_p1 = pnand %p1239_p10, %p1238_p4 }
  0xb0   : > { %828 = dma.done.wait (!%p706_p1), %s628_s27, 512  }
  0xb1   : > { %830 = vsyncadd (!%p706_p1), %s628_s27, 4294966784  ;;  %p14_p3 = scmp.ge.s32.totalorder %s890_s12, 4   ;;  %s1240_s6 = smov %s837_s7 }
  0xb2   : > { %s1241_s7 = smov %s841_s8  ;;  %s1242_s8 = smov %s902_s15 }
  0xb3   : > { %s1243_s9 = smov %s890_s12  ;;  %16 = sbr.rel (!%p14_p3) target bundleno = 5 (0x5), region = 69 }
  0xba   :  { %633 = vsyncpa [#allocation3], 1 }
  0xbb   :  { %635 = vsyncpa [#allocation3 + $0x1], 1 }
  0xbc   :  { %636 = vsyncpa [#allocation4], 1 }
  0xbd   :  { %638 = vsyncpa [#allocation4 + $0x1], 1 }

</bundles_post_ra>
